<compile_context>
chip_gen: v5e
topology: v5e:2x2
jax: 0.10.0
libtpu: 0.0.40
codegen_flags: <defaults>
</compile_context>

<pallas_src>
import math
import functools

import jax
import jax.numpy as jnp
from jax import lax
from jax.experimental import pallas as pl
from jax.experimental.pallas import tpu as pltpu

_NEG_CROSS = -1e30    # "minus infinity" for padded attention keys
_NEG_PADCOL = -1e18   # padded customer columns: never selectable


def _round_up(x, m):
    return (x + m - 1) // m * m


def action_selector_kernel(
    veh_ref,    # (Bt*Mp, Din)  packed vehicle states (Mp = padded #vehicles)
    cust_ref,   # (Bt*Np, E)    packed customer embeddings (Np = padded #customers)
    mask_ref,   # (Bt, Mp, Np)  additive customer mask (row 0 per batch = dummy)
    abias_ref,  # (1, Mp)       additive attention key mask (0 real / -1e30 pad)
    wqkv_ref,   # (Din, 3E)     folded fc_vehicle -> fused QKV in-proj (q pre-scaled)
    bqkv_ref,   # (1, 3E)
    woq_ref,    # (E, E)        folded out_proj @ W_Q
    boq_ref,    # (1, E)        folded out_proj bias @ W_Q
    wk_ref,     # (E, E)        W_K pre-scaled by 1/sqrt(E)
    sel_ref,    # (1, Bt, Mp)   int32 greedy selections
    *,
    heads: int,
    bt: int,
    m_pad: int,
    n_pad: int,
    compute_dtype=jnp.float32,
):
    f32 = jnp.float32
    cd = compute_dtype
    E = wk_ref.shape[0]
    Dh = E // heads

    x = veh_ref[...].astype(cd)                          # (Bt*Mp, Din)
    cust = cust_ref[...].astype(cd)                      # (Bt*Np, E)

    # ---- fused, folded projection: q|k|v for all heads in one matmul --------
    qkv = jnp.dot(x, wqkv_ref[...].astype(cd),
                  preferred_element_type=f32) + bqkv_ref[...]   # (Bt*Mp, 3E) f32
    qkv = qkv.astype(cd).reshape(bt, m_pad, 3 * E)       # cast once, then slice

    abias = abias_ref[...]                               # (1, Mp) f32

    # ---- per-batch multi-head attention (block form, no cross-batch work) ---
    o_heads = []
    for hh in range(heads):                              # heads is small & static
        q_h = qkv[:, :, hh * Dh:(hh + 1) * Dh]           # (Bt, Mp, Dh)
        k_h = qkv[:, :, E + hh * Dh:E + (hh + 1) * Dh]
        v_h = qkv[:, :, 2 * E + hh * Dh:2 * E + (hh + 1) * Dh]
        s = jnp.einsum('bqd,bkd->bqk', q_h, k_h,
                       preferred_element_type=f32)       # (Bt, Mp, Mp) f32
        s = s + abias                                    # mask padded keys
        s = s - jnp.max(s, axis=-1, keepdims=True)
        p = jnp.exp(s)
        o_h = jnp.einsum('bqk,bkd->bqd', p.astype(cd), v_h,
                         preferred_element_type=f32)     # (Bt, Mp, Dh)
        inv = pl.reciprocal(jnp.sum(p, axis=-1, keepdims=True), approx=True)
        o_heads.append((o_h * inv).astype(cd))           # deferred normalization
    o = jnp.concatenate(o_heads, axis=-1)                # (Bt, Mp, E)

    # ---- single out-projection (out_proj @ W_Q folded) -----------------------
    qc = jnp.dot(o.reshape(bt * m_pad, E), woq_ref[...].astype(cd),
                 preferred_element_type=f32) + boq_ref[...]      # (Bt*Mp, E) f32
    qc = qc.astype(cd).reshape(bt, m_pad, E)

    # ---- compatibility scores, per packed batch block ------------------------
    kc = jnp.dot(cust, wk_ref[...].astype(cd),
                 preferred_element_type=f32)             # (Bt*Np, E) f32
    kc = kc.astype(cd).reshape(bt, n_pad, E)
    sc = jnp.einsum('bme,bne->bmn', qc, kc,
                    preferred_element_type=f32)          # (Bt, Mp, Np) f32
    sc = jnp.tanh(sc) + mask_ref[...]                    # mask add stays f32

    # ---- greedy argmax directly on masked scores (softmax is argmax-invariant)
    row_max = jnp.max(sc, axis=-1, keepdims=True)
    col = lax.broadcasted_iota(jnp.int32, sc.shape, 2)   # local customer index
    sel = jnp.min(jnp.where(sc >= row_max, col, n_pad), axis=-1)   # (Bt, Mp)
    sel_ref[0] = sel.astype(jnp.int32)
    # TODO(synk): 'sampling' mode (torch.multinomial + log_probs + entropy) would
    # need in-kernel RNG (pltpu.prng_*); only the 'greedy' path is implemented.


def action_selector_forward(veh_x, cust_x, neg_inf_mask, params, heads,
                            row_budget=512, target_cores=1,
                            compute_dtype=jnp.float32):
    """Greedy forward. Returns (selected_actions (B, M-1) int32, None, None).

    row_budget: packed rows (Bt * padded-M) per grid step.  ~512-1024 is fine
      on v5e/v6e (128 MiB VMEM); keep <=512 on v7x (64 MiB VMEM) or pass an
      explicit vmem_limit_bytes for bigger tiles.
    target_cores: set 2 on v7x so the grid count is even across both TCs.
    compute_dtype: jnp.bfloat16 feeds bf16 MXU operands on v6e/v7x (f32
      accumulation and f32 mask adds kept); default f32 for exact parity.
    """
    B, M, Din = veh_x.shape
    _, N, E = cust_x.shape
    Mv = M - 1
    assert neg_inf_mask.shape == (B, Mv, N)
    assert E % heads == 0

    Mp = _round_up(M, 8)
    Np = _round_up(N, 8)

    # ---- host-side weight folding (exact algebra, done once per call) -------
    w_qkv = jnp.concatenate([params["wq_in"], params["wk_in"], params["wv_in"]], axis=1)
    b_qkv = jnp.concatenate([params["bq"], params["bk"], params["bv"]], axis=1)
    w_qkv_fold = params["fc_w"] @ w_qkv                    # fold fc_vehicle into QKV
    b_qkv_fold = params["fc_b"] @ w_qkv + b_qkv
    q_scale = 1.0 / math.sqrt(E // heads)
    w_qkv_fold = w_qkv_fold.at[:, :E].multiply(q_scale)    # fold 1/sqrt(Dh) into q
    b_qkv_fold = b_qkv_fold.at[:, :E].multiply(q_scale)
    w_oq = params["wo"] @ params["WQ"]                     # fold out_proj into W_Q
    b_oq = params["bo"] @ params["WQ"]
    w_k = params["WK"] * (1.0 / math.sqrt(E))              # fold 1/sqrt(E) into W_K

    # ---- host-side padding + masks (precomputed once, grid-invariant) -------
    veh_p = jnp.zeros((B, Mp, Din), jnp.float32).at[:, :M, :].set(veh_x)
    cust_p = jnp.zeros((B, Np, E), jnp.float32).at[:, :N, :].set(cust_x)
    mask_p = jnp.full((B, Mp, Np), _NEG_PADCOL, jnp.float32)
    mask_p = mask_p.at[:, :, :N].set(0.0)                  # real columns free by default
    mask_p = mask_p.at[:, 1:M, :N].set(neg_inf_mask)       # row 0 / pad rows = dummies
    veh2d = veh_p.reshape(B * Mp, Din)
    cust2d = cust_p.reshape(B * Np, E)
    attn_bias = jnp.where(jnp.arange(Mp) < M, 0.0, _NEG_CROSS)
    attn_bias = attn_bias.astype(jnp.float32).reshape(1, Mp)

    # ---- batch packing: Bt batches per grid step -----------------------------
    divisors = [d for d in range(1, B + 1) if B % d == 0 and d * Mp <= row_budget]
    if not divisors:
        divisors = [1]
    tc = max(int(target_cores), 1)
    cands = [d for d in divisors if (B // d) % tc == 0] or divisors
    Bt = max(cands)                       # fewest, biggest steps (g=1 OK on 1-TC chips)
    g = B // Bt
    R = Bt * Mp
    C = Bt * Np

    full_spec = lambda a: pl.BlockSpec(a.shape, lambda i: (0,) * a.ndim)
    weights = [attn_bias, w_qkv_fold, b_qkv_fold, w_oq, b_oq, w_k]

    out = pl.pallas_call(
        functools.partial(action_selector_kernel, heads=heads, bt=Bt,
                          m_pad=Mp, n_pad=Np, compute_dtype=compute_dtype),
        out_shape=jax.ShapeDtypeStruct((g, Bt, Mp), jnp.int32),
        grid_spec=pltpu.PrefetchScalarGridSpec(
            num_scalar_prefetch=0,
            grid=(g,),
            in_specs=[
                pl.BlockSpec((R, Din), lambda i: (i, 0)),
                pl.BlockSpec((C, E), lambda i: (i, 0)),
                pl.BlockSpec((Bt, Mp, Np), lambda i: (i, 0, 0)),
            ] + [full_spec(w) for w in weights],      # masks/weights stay VMEM-resident
            out_specs=pl.BlockSpec((1, Bt, Mp), lambda i: (i, 0, 0)),
        ),
        compiler_params=pltpu.CompilerParams(
            dimension_semantics=("parallel",),
        ),
    )(veh2d, cust2d, mask_p, *weights)

    sel = out.reshape(B, Mp)[:, 1:M]     # drop dummy row 0 + padded vehicle rows
    return sel, None, None


def reference_forward(veh_x, cust_x, neg_inf_mask, params, heads):
    """Pure-JAX reference of the greedy forward (unfolded weights)."""
    E = params["fc_w"].shape[1]
    Dh = E // heads
    h = jnp.einsum("bmd,de->bme", veh_x, params["fc_w"]) + params["fc_b"]
    q = jnp.einsum("bme,ef->bmf", h, params["wq_in"]) + params["bq"]
    k = jnp.einsum("bme,ef->bmf", h, params["wk_in"]) + params["bk"]
    v = jnp.einsum("bme,ef->bmf", h, params["wv_in"]) + params["bv"]
    B, M, _ = q.shape
    qh = q.reshape(B, M, heads, Dh)
    kh = k.reshape(B, M, heads, Dh)
    vh = v.reshape(B, M, heads, Dh)
    s = jnp.einsum("bqhd,bkhd->bhqk", qh, kh) / math.sqrt(Dh)
    p = jax.nn.softmax(s, axis=-1)
    o = jnp.einsum("bhqk,bkhd->bqhd", p, vh).reshape(B, M, E)
    o = jnp.einsum("bme,ef->bmf", o, params["wo"]) + params["bo"]
    veh_emb = o[:, 1:]
    qc = jnp.einsum("bme,ef->bmf", veh_emb, params["WQ"])
    kc = jnp.einsum("bne,ef->bnf", cust_x, params["WK"])
    scores = jnp.tanh(jnp.einsum("bme,bne->bmn", qc, kc) / math.sqrt(E)) + neg_inf_mask
    probs = jax.nn.softmax(scores, axis=-1)
    return jnp.argmax(probs, axis=-1).astype(jnp.int32), scores


if __name__ == "__main__":
    # small shapes consistent with the module's forward
    B, M, N = 2, 5, 8          # M vehicles (first dropped after MHA), N customers
    E, heads = 32, 4           # embedding_dim, attention heads
    Dv = 8                     # dynamic vehicle dim

    key = jax.random.PRNGKey(0)
    ks = jax.random.split(key, 16)
    std = 0.1

    params = {
        "fc_w": std * jax.random.normal(ks[0], (E + Dv, E), jnp.float32),
        "fc_b": std * jax.random.normal(ks[1], (1, E), jnp.float32),
        "wq_in": std * jax.random.normal(ks[2], (E, E), jnp.float32),
        "wk_in": std * jax.random.normal(ks[3], (E, E), jnp.float32),
        "wv_in": std * jax.random.normal(ks[4], (E, E), jnp.float32),
        "bq": std * jax.random.normal(ks[5], (1, E), jnp.float32),
        "bk": std * jax.random.normal(ks[6], (1, E), jnp.float32),
        "bv": std * jax.random.normal(ks[7], (1, E), jnp.float32),
        "wo": std * jax.random.normal(ks[8], (E, E), jnp.float32),
        "bo": std * jax.random.normal(ks[9], (1, E), jnp.float32),
        "WQ": std * jax.random.normal(ks[10], (E, E), jnp.float32),
        "WK": std * jax.random.normal(ks[11], (E, E), jnp.float32),
    }

    veh_x = jax.random.normal(ks[12], (B, M, E + Dv), jnp.float32)
    cust_x = jax.random.normal(ks[13], (B, N, E), jnp.float32)

    # additive mask: large negative for forbidden actions, 0 otherwise; column 0
    # is always feasible.
    mask_bits = jax.random.bernoulli(ks[14], p=0.3, shape=(B, M - 1, N))
    neg_inf_mask = jnp.where(mask_bits, -1e9, 0.0).astype(jnp.float32)
    neg_inf_mask = neg_inf_mask.at[:, :, 0].set(0.0)

    sel, log_probs, entropy = action_selector_forward(
        veh_x, cust_x, neg_inf_mask, params, heads
    )
    sel = jax.block_until_ready(sel)

    ref_sel, ref_scores = reference_forward(veh_x, cust_x, neg_inf_mask, params, heads)
    assert sel.shape == (B, M - 1) and sel.dtype == jnp.int32
    # robust greedy-correctness check: the kernel-selected action must attain the
    # per-row maximum of the reference masked scores (tolerant to fp near-ties).
    sel_score = jnp.take_along_axis(ref_scores, sel[..., None], axis=-1)[..., 0]
    assert bool(jnp.all(sel_score >= ref_scores.max(-1) - 1e-4)), (sel, ref_sel)

    print("KERNEL_OK")
</pallas_src>

<mosaic_0001>
module attributes {stable_mosaic.version = 11 : i64} {
  func.func @action_selector_kernel(%arg0: i32, %arg1: memref<16x40xf32, #tpu.memory_space<vmem>>, %arg2: memref<16x32xf32, #tpu.memory_space<vmem>>, %arg3: memref<2x8x8xf32, #tpu.memory_space<vmem>>, %arg4: memref<1x8xf32, #tpu.memory_space<vmem>>, %arg5: memref<40x96xf32, #tpu.memory_space<vmem>>, %arg6: memref<1x96xf32, #tpu.memory_space<vmem>>, %arg7: memref<32x32xf32, #tpu.memory_space<vmem>>, %arg8: memref<1x32xf32, #tpu.memory_space<vmem>>, %arg9: memref<32x32xf32, #tpu.memory_space<vmem>>, %arg10: memref<1x2x8xi32, #tpu.memory_space<vmem>>) attributes {dimension_semantics = [#tpu.dimension_semantics<parallel>], iteration_bounds = array<i64: 1>, scalar_prefetch = 0 : i64, scratch_operands = 0 : i64, tpu.core_type = #tpu.core_type<tc>, window_params = [{transform_indices = @transform_0, window_bounds = array<i64: 16, 40>}, {transform_indices = @transform_1, window_bounds = array<i64: 16, 32>}, {transform_indices = @transform_2, window_bounds = array<i64: 2, 8, 8>}, {pipeline_mode = #tpu.pipeline_mode<synchronous>, transform_indices = @transform_3, window_bounds = array<i64: 1, 8>}, {pipeline_mode = #tpu.pipeline_mode<synchronous>, transform_indices = @transform_4, window_bounds = array<i64: 40, 96>}, {pipeline_mode = #tpu.pipeline_mode<synchronous>, transform_indices = @transform_5, window_bounds = array<i64: 1, 96>}, {pipeline_mode = #tpu.pipeline_mode<synchronous>, transform_indices = @transform_6, window_bounds = array<i64: 32, 32>}, {pipeline_mode = #tpu.pipeline_mode<synchronous>, transform_indices = @transform_7, window_bounds = array<i64: 1, 32>}, {pipeline_mode = #tpu.pipeline_mode<synchronous>, transform_indices = @transform_8, window_bounds = array<i64: 32, 32>}, {transform_indices = @transform_9, window_bounds = array<i64: 1, 2, 8>}]} {
    %c0 = arith.constant 0 : index
    %c0_0 = arith.constant 0 : index
    %0 = vector.load %arg1[%c0, %c0_0] : memref<16x40xf32, #tpu.memory_space<vmem>>, vector<16x40xf32>
    %c0_1 = arith.constant 0 : index
    %c0_2 = arith.constant 0 : index
    %1 = vector.load %arg2[%c0_1, %c0_2] : memref<16x32xf32, #tpu.memory_space<vmem>>, vector<16x32xf32>
    %c0_3 = arith.constant 0 : index
    %c0_4 = arith.constant 0 : index
    %2 = vector.load %arg5[%c0_3, %c0_4] : memref<40x96xf32, #tpu.memory_space<vmem>>, vector<40x96xf32>
    %cst = arith.constant dense<0.000000e+00> : vector<16x96xf32>
    %3 = tpu.matmul %0, %2, %cst {dimension_numbers = #tpu.dot_dimension_numbers<[1], [0], [0], [1], [0, 0, 1, 1], [], []>} : vector<16x40xf32>, vector<40x96xf32>, vector<16x96xf32> -> vector<16x96xf32>
    %c0_5 = arith.constant 0 : index
    %c0_6 = arith.constant 0 : index
    %4 = vector.load %arg6[%c0_5, %c0_6] : memref<1x96xf32, #tpu.memory_space<vmem>>, vector<1x96xf32>
    %5 = vector.broadcast %4 : vector<1x96xf32> to vector<16x96xf32>
    %6 = arith.addf %3, %5 : vector<16x96xf32>
    %7 = vector.shape_cast %6 : vector<16x96xf32> to vector<2x8x96xf32>
    %c0_7 = arith.constant 0 : index
    %c0_8 = arith.constant 0 : index
    %8 = vector.load %arg4[%c0_7, %c0_8] : memref<1x8xf32, #tpu.memory_space<vmem>>, vector<1x8xf32>
    %9 = vector.extract_strided_slice %7 {offsets = [0, 0, 0], sizes = [2, 8, 8], strides = [1, 1, 1]} : vector<2x8x96xf32> to vector<2x8x8xf32>
    %10 = vector.extract_strided_slice %7 {offsets = [0, 0, 32], sizes = [2, 8, 8], strides = [1, 1, 1]} : vector<2x8x96xf32> to vector<2x8x8xf32>
    %11 = vector.extract_strided_slice %7 {offsets = [0, 0, 64], sizes = [2, 8, 8], strides = [1, 1, 1]} : vector<2x8x96xf32> to vector<2x8x8xf32>
    "tpu.trace_start"() <{level = 10 : i32, message = "bqd,bkd->bqk"}> : () -> ()
    %cst_9 = arith.constant dense<0.000000e+00> : vector<2x8x8xf32>
    %12 = tpu.matmul %9, %10, %cst_9 {dimension_numbers = #tpu.dot_dimension_numbers<[2], [2], [1], [1], [0, 0, 0, 1, 1, 1], [0], [0]>} : vector<2x8x8xf32>, vector<2x8x8xf32>, vector<2x8x8xf32> -> vector<2x8x8xf32>
    "tpu.trace_stop"() : () -> ()
    %13 = vector.shape_cast %8 : vector<1x8xf32> to vector<1x1x8xf32>
    %14 = vector.broadcast %13 : vector<1x1x8xf32> to vector<2x8x8xf32>
    %15 = arith.addf %12, %14 : vector<2x8x8xf32>
    %cst_10 = arith.constant dense<0xFF800000> : vector<2x8xf32>
    %16 = vector.multi_reduction <maximumf>, %15, %cst_10 [2] : vector<2x8x8xf32> to vector<2x8xf32>
    %17 = vector.shape_cast %16 : vector<2x8xf32> to vector<2x8x1xf32>
    %18 = vector.broadcast %17 : vector<2x8x1xf32> to vector<2x8x8xf32>
    %19 = arith.subf %15, %18 : vector<2x8x8xf32>
    %20 = math.exp %19 : vector<2x8x8xf32>
    "tpu.trace_start"() <{level = 10 : i32, message = "bqk,bkd->bqd"}> : () -> ()
    %cst_11 = arith.constant dense<0.000000e+00> : vector<2x8x8xf32>
    %21 = tpu.matmul %20, %11, %cst_11 {dimension_numbers = #tpu.dot_dimension_numbers<[2], [1], [1], [2], [0, 0, 0, 1, 1, 2], [0], [0]>} : vector<2x8x8xf32>, vector<2x8x8xf32>, vector<2x8x8xf32> -> vector<2x8x8xf32>
    "tpu.trace_stop"() : () -> ()
    %cst_12 = arith.constant dense<0.000000e+00> : vector<2x8xf32>
    %22 = vector.multi_reduction <add>, %20, %cst_12 [2] : vector<2x8x8xf32> to vector<2x8xf32>
    %23 = vector.shape_cast %22 : vector<2x8xf32> to vector<2x8x1xf32>
    %24 = tpu.reciprocal %23 {approx = true} : vector<2x8x1xf32> -> vector<2x8x1xf32>
    %25 = vector.broadcast %24 : vector<2x8x1xf32> to vector<2x8x8xf32>
    %26 = arith.mulf %21, %25 : vector<2x8x8xf32>
    %27 = vector.extract_strided_slice %7 {offsets = [0, 0, 8], sizes = [2, 8, 8], strides = [1, 1, 1]} : vector<2x8x96xf32> to vector<2x8x8xf32>
    %28 = vector.extract_strided_slice %7 {offsets = [0, 0, 40], sizes = [2, 8, 8], strides = [1, 1, 1]} : vector<2x8x96xf32> to vector<2x8x8xf32>
    %29 = vector.extract_strided_slice %7 {offsets = [0, 0, 72], sizes = [2, 8, 8], strides = [1, 1, 1]} : vector<2x8x96xf32> to vector<2x8x8xf32>
    "tpu.trace_start"() <{level = 10 : i32, message = "bqd,bkd->bqk"}> : () -> ()
    %cst_13 = arith.constant dense<0.000000e+00> : vector<2x8x8xf32>
    %30 = tpu.matmul %27, %28, %cst_13 {dimension_numbers = #tpu.dot_dimension_numbers<[2], [2], [1], [1], [0, 0, 0, 1, 1, 1], [0], [0]>} : vector<2x8x8xf32>, vector<2x8x8xf32>, vector<2x8x8xf32> -> vector<2x8x8xf32>
    "tpu.trace_stop"() : () -> ()
    %31 = vector.shape_cast %8 : vector<1x8xf32> to vector<1x1x8xf32>
    %32 = vector.broadcast %31 : vector<1x1x8xf32> to vector<2x8x8xf32>
    %33 = arith.addf %30, %32 : vector<2x8x8xf32>
    %cst_14 = arith.constant dense<0xFF800000> : vector<2x8xf32>
    %34 = vector.multi_reduction <maximumf>, %33, %cst_14 [2] : vector<2x8x8xf32> to vector<2x8xf32>
    %35 = vector.shape_cast %34 : vector<2x8xf32> to vector<2x8x1xf32>
    %36 = vector.broadcast %35 : vector<2x8x1xf32> to vector<2x8x8xf32>
    %37 = arith.subf %33, %36 : vector<2x8x8xf32>
    %38 = math.exp %37 : vector<2x8x8xf32>
    "tpu.trace_start"() <{level = 10 : i32, message = "bqk,bkd->bqd"}> : () -> ()
    %cst_15 = arith.constant dense<0.000000e+00> : vector<2x8x8xf32>
    %39 = tpu.matmul %38, %29, %cst_15 {dimension_numbers = #tpu.dot_dimension_numbers<[2], [1], [1], [2], [0, 0, 0, 1, 1, 2], [0], [0]>} : vector<2x8x8xf32>, vector<2x8x8xf32>, vector<2x8x8xf32> -> vector<2x8x8xf32>
    "tpu.trace_stop"() : () -> ()
    %cst_16 = arith.constant dense<0.000000e+00> : vector<2x8xf32>
    %40 = vector.multi_reduction <add>, %38, %cst_16 [2] : vector<2x8x8xf32> to vector<2x8xf32>
    %41 = vector.shape_cast %40 : vector<2x8xf32> to vector<2x8x1xf32>
    %42 = tpu.reciprocal %41 {approx = true} : vector<2x8x1xf32> -> vector<2x8x1xf32>
    %43 = vector.broadcast %42 : vector<2x8x1xf32> to vector<2x8x8xf32>
    %44 = arith.mulf %39, %43 : vector<2x8x8xf32>
    %45 = vector.extract_strided_slice %7 {offsets = [0, 0, 16], sizes = [2, 8, 8], strides = [1, 1, 1]} : vector<2x8x96xf32> to vector<2x8x8xf32>
    %46 = vector.extract_strided_slice %7 {offsets = [0, 0, 48], sizes = [2, 8, 8], strides = [1, 1, 1]} : vector<2x8x96xf32> to vector<2x8x8xf32>
    %47 = vector.extract_strided_slice %7 {offsets = [0, 0, 80], sizes = [2, 8, 8], strides = [1, 1, 1]} : vector<2x8x96xf32> to vector<2x8x8xf32>
    "tpu.trace_start"() <{level = 10 : i32, message = "bqd,bkd->bqk"}> : () -> ()
    %cst_17 = arith.constant dense<0.000000e+00> : vector<2x8x8xf32>
    %48 = tpu.matmul %45, %46, %cst_17 {dimension_numbers = #tpu.dot_dimension_numbers<[2], [2], [1], [1], [0, 0, 0, 1, 1, 1], [0], [0]>} : vector<2x8x8xf32>, vector<2x8x8xf32>, vector<2x8x8xf32> -> vector<2x8x8xf32>
    "tpu.trace_stop"() : () -> ()
    %49 = vector.shape_cast %8 : vector<1x8xf32> to vector<1x1x8xf32>
    %50 = vector.broadcast %49 : vector<1x1x8xf32> to vector<2x8x8xf32>
    %51 = arith.addf %48, %50 : vector<2x8x8xf32>
    %cst_18 = arith.constant dense<0xFF800000> : vector<2x8xf32>
    %52 = vector.multi_reduction <maximumf>, %51, %cst_18 [2] : vector<2x8x8xf32> to vector<2x8xf32>
    %53 = vector.shape_cast %52 : vector<2x8xf32> to vector<2x8x1xf32>
    %54 = vector.broadcast %53 : vector<2x8x1xf32> to vector<2x8x8xf32>
    %55 = arith.subf %51, %54 : vector<2x8x8xf32>
    %56 = math.exp %55 : vector<2x8x8xf32>
    "tpu.trace_start"() <{level = 10 : i32, message = "bqk,bkd->bqd"}> : () -> ()
    %cst_19 = arith.constant dense<0.000000e+00> : vector<2x8x8xf32>
    %57 = tpu.matmul %56, %47, %cst_19 {dimension_numbers = #tpu.dot_dimension_numbers<[2], [1], [1], [2], [0, 0, 0, 1, 1, 2], [0], [0]>} : vector<2x8x8xf32>, vector<2x8x8xf32>, vector<2x8x8xf32> -> vector<2x8x8xf32>
    "tpu.trace_stop"() : () -> ()
    %cst_20 = arith.constant dense<0.000000e+00> : vector<2x8xf32>
    %58 = vector.multi_reduction <add>, %56, %cst_20 [2] : vector<2x8x8xf32> to vector<2x8xf32>
    %59 = vector.shape_cast %58 : vector<2x8xf32> to vector<2x8x1xf32>
    %60 = tpu.reciprocal %59 {approx = true} : vector<2x8x1xf32> -> vector<2x8x1xf32>
    %61 = vector.broadcast %60 : vector<2x8x1xf32> to vector<2x8x8xf32>
    %62 = arith.mulf %57, %61 : vector<2x8x8xf32>
    %63 = vector.extract_strided_slice %7 {offsets = [0, 0, 24], sizes = [2, 8, 8], strides = [1, 1, 1]} : vector<2x8x96xf32> to vector<2x8x8xf32>
    %64 = vector.extract_strided_slice %7 {offsets = [0, 0, 56], sizes = [2, 8, 8], strides = [1, 1, 1]} : vector<2x8x96xf32> to vector<2x8x8xf32>
    %65 = vector.extract_strided_slice %7 {offsets = [0, 0, 88], sizes = [2, 8, 8], strides = [1, 1, 1]} : vector<2x8x96xf32> to vector<2x8x8xf32>
    "tpu.trace_start"() <{level = 10 : i32, message = "bqd,bkd->bqk"}> : () -> ()
    %cst_21 = arith.constant dense<0.000000e+00> : vector<2x8x8xf32>
    %66 = tpu.matmul %63, %64, %cst_21 {dimension_numbers = #tpu.dot_dimension_numbers<[2], [2], [1], [1], [0, 0, 0, 1, 1, 1], [0], [0]>} : vector<2x8x8xf32>, vector<2x8x8xf32>, vector<2x8x8xf32> -> vector<2x8x8xf32>
    "tpu.trace_stop"() : () -> ()
    %67 = vector.shape_cast %8 : vector<1x8xf32> to vector<1x1x8xf32>
    %68 = vector.broadcast %67 : vector<1x1x8xf32> to vector<2x8x8xf32>
    %69 = arith.addf %66, %68 : vector<2x8x8xf32>
    %cst_22 = arith.constant dense<0xFF800000> : vector<2x8xf32>
    %70 = vector.multi_reduction <maximumf>, %69, %cst_22 [2] : vector<2x8x8xf32> to vector<2x8xf32>
    %71 = vector.shape_cast %70 : vector<2x8xf32> to vector<2x8x1xf32>
    %72 = vector.broadcast %71 : vector<2x8x1xf32> to vector<2x8x8xf32>
    %73 = arith.subf %69, %72 : vector<2x8x8xf32>
    %74 = math.exp %73 : vector<2x8x8xf32>
    "tpu.trace_start"() <{level = 10 : i32, message = "bqk,bkd->bqd"}> : () -> ()
    %cst_23 = arith.constant dense<0.000000e+00> : vector<2x8x8xf32>
    %75 = tpu.matmul %74, %65, %cst_23 {dimension_numbers = #tpu.dot_dimension_numbers<[2], [1], [1], [2], [0, 0, 0, 1, 1, 2], [0], [0]>} : vector<2x8x8xf32>, vector<2x8x8xf32>, vector<2x8x8xf32> -> vector<2x8x8xf32>
    "tpu.trace_stop"() : () -> ()
    %cst_24 = arith.constant dense<0.000000e+00> : vector<2x8xf32>
    %76 = vector.multi_reduction <add>, %74, %cst_24 [2] : vector<2x8x8xf32> to vector<2x8xf32>
    %77 = vector.shape_cast %76 : vector<2x8xf32> to vector<2x8x1xf32>
    %78 = tpu.reciprocal %77 {approx = true} : vector<2x8x1xf32> -> vector<2x8x1xf32>
    %79 = vector.broadcast %78 : vector<2x8x1xf32> to vector<2x8x8xf32>
    %80 = arith.mulf %75, %79 : vector<2x8x8xf32>
    %81 = tpu.concatenate %26, %44, %62, %80 in 2 : vector<2x8x8xf32>, vector<2x8x8xf32>, vector<2x8x8xf32>, vector<2x8x8xf32> -> vector<2x8x32xf32>
    %82 = vector.shape_cast %81 : vector<2x8x32xf32> to vector<16x32xf32>
    %c0_25 = arith.constant 0 : index
    %c0_26 = arith.constant 0 : index
    %83 = vector.load %arg7[%c0_25, %c0_26] : memref<32x32xf32, #tpu.memory_space<vmem>>, vector<32x32xf32>
    %cst_27 = arith.constant dense<0.000000e+00> : vector<16x32xf32>
    %84 = tpu.matmul %82, %83, %cst_27 {dimension_numbers = #tpu.dot_dimension_numbers<[1], [0], [0], [1], [0, 0, 1, 1], [], []>} : vector<16x32xf32>, vector<32x32xf32>, vector<16x32xf32> -> vector<16x32xf32>
    %c0_28 = arith.constant 0 : index
    %c0_29 = arith.constant 0 : index
    %85 = vector.load %arg8[%c0_28, %c0_29] : memref<1x32xf32, #tpu.memory_space<vmem>>, vector<1x32xf32>
    %86 = vector.broadcast %85 : vector<1x32xf32> to vector<16x32xf32>
    %87 = arith.addf %84, %86 : vector<16x32xf32>
    %88 = vector.shape_cast %87 : vector<16x32xf32> to vector<2x8x32xf32>
    %c0_30 = arith.constant 0 : index
    %c0_31 = arith.constant 0 : index
    %89 = vector.load %arg9[%c0_30, %c0_31] : memref<32x32xf32, #tpu.memory_space<vmem>>, vector<32x32xf32>
    %cst_32 = arith.constant dense<0.000000e+00> : vector<16x32xf32>
    %90 = tpu.matmul %1, %89, %cst_32 {dimension_numbers = #tpu.dot_dimension_numbers<[1], [0], [0], [1], [0, 0, 1, 1], [], []>} : vector<16x32xf32>, vector<32x32xf32>, vector<16x32xf32> -> vector<16x32xf32>
    %91 = vector.shape_cast %90 : vector<16x32xf32> to vector<2x8x32xf32>
    "tpu.trace_start"() <{level = 10 : i32, message = "bme,bne->bmn"}> : () -> ()
    %cst_33 = arith.constant dense<0.000000e+00> : vector<2x8x8xf32>
    %92 = tpu.matmul %88, %91, %cst_33 {dimension_numbers = #tpu.dot_dimension_numbers<[2], [2], [1], [1], [0, 0, 0, 1, 1, 1], [0], [0]>} : vector<2x8x32xf32>, vector<2x8x32xf32>, vector<2x8x8xf32> -> vector<2x8x8xf32>
    "tpu.trace_stop"() : () -> ()
    %93 = math.tanh %92 : vector<2x8x8xf32>
    %c0_34 = arith.constant 0 : index
    %c0_35 = arith.constant 0 : index
    %c0_36 = arith.constant 0 : index
    %94 = vector.load %arg3[%c0_34, %c0_35, %c0_36] : memref<2x8x8xf32, #tpu.memory_space<vmem>>, vector<2x8x8xf32>
    %95 = arith.addf %93, %94 : vector<2x8x8xf32>
    %cst_37 = arith.constant dense<0xFF800000> : vector<2x8xf32>
    %96 = vector.multi_reduction <maximumf>, %95, %cst_37 [2] : vector<2x8x8xf32> to vector<2x8xf32>
    %97 = vector.shape_cast %96 : vector<2x8xf32> to vector<2x8x1xf32>
    %98 = tpu.iota {dimensions = array<i32: 2>} : vector<2x8x8xi32>
    %99 = vector.broadcast %97 : vector<2x8x1xf32> to vector<2x8x8xf32>
    %100 = arith.cmpf oge, %95, %99 : vector<2x8x8xf32>
    %c8_i32 = arith.constant 8 : i32
    %101 = vector.broadcast %c8_i32 : i32 to vector<2x8x8xi32>
    %102 = arith.select %100, %98, %101 : vector<2x8x8xi1>, vector<2x8x8xi32>
    %cst_38 = arith.constant dense<2147483647> : vector<2x8xi32>
    %103 = vector.multi_reduction <minsi>, %102, %cst_38 [2] : vector<2x8x8xi32> to vector<2x8xi32>
    %c0_39 = arith.constant 0 : index
    %c0_40 = arith.constant 0 : index
    %c0_41 = arith.constant 0 : index
    %104 = vector.load %arg10[%c0_39, %c0_40, %c0_41] : memref<1x2x8xi32, #tpu.memory_space<vmem>>, vector<1x2x8xi32>
    %105 = vector.shape_cast %104 : vector<1x2x8xi32> to vector<2x8xi32>
    %106 = vector.shape_cast %103 : vector<2x8xi32> to vector<1x2x8xi32>
    tpu.vector_store %arg10[%c0_39, %c0_40, %c0_41], %106 {strides = array<i32>} : memref<1x2x8xi32, #tpu.memory_space<vmem>>, vector<1x2x8xi32>,
    return
  }
  func.func @transform_0(%arg0: i32) -> (i32, i32) {
    %c0_i32 = arith.constant 0 : i32
    %c0_i32_0 = arith.constant 0 : i32
    return %arg0, %c0_i32 : i32, i32
  }
  func.func @transform_1(%arg0: i32) -> (i32, i32) {
    %c0_i32 = arith.constant 0 : i32
    %c0_i32_0 = arith.constant 0 : i32
    return %arg0, %c0_i32 : i32, i32
  }
  func.func @transform_2(%arg0: i32) -> (i32, i32, i32) {
    %c0_i32 = arith.constant 0 : i32
    %c0_i32_0 = arith.constant 0 : i32
    %c0_i32_1 = arith.constant 0 : i32
    return %arg0, %c0_i32, %c0_i32_0 : i32, i32, i32
  }
  func.func @transform_3(%arg0: i32) -> (i32, i32) {
    %c0_i32 = arith.constant 0 : i32
    %c0_i32_0 = arith.constant 0 : i32
    %c0_i32_1 = arith.constant 0 : i32
    return %c0_i32, %c0_i32_0 : i32, i32
  }
  func.func @transform_4(%arg0: i32) -> (i32, i32) {
    %c0_i32 = arith.constant 0 : i32
    %c0_i32_0 = arith.constant 0 : i32
    %c0_i32_1 = arith.constant 0 : i32
    return %c0_i32, %c0_i32_0 : i32, i32
  }
  func.func @transform_5(%arg0: i32) -> (i32, i32) {
    %c0_i32 = arith.constant 0 : i32
    %c0_i32_0 = arith.constant 0 : i32
    %c0_i32_1 = arith.constant 0 : i32
    return %c0_i32, %c0_i32_0 : i32, i32
  }
  func.func @transform_6(%arg0: i32) -> (i32, i32) {
    %c0_i32 = arith.constant 0 : i32
    %c0_i32_0 = arith.constant 0 : i32
    %c0_i32_1 = arith.constant 0 : i32
    return %c0_i32, %c0_i32_0 : i32, i32
  }
  func.func @transform_7(%arg0: i32) -> (i32, i32) {
    %c0_i32 = arith.constant 0 : i32
    %c0_i32_0 = arith.constant 0 : i32
    %c0_i32_1 = arith.constant 0 : i32
    return %c0_i32, %c0_i32_0 : i32, i32
  }
  func.func @transform_8(%arg0: i32) -> (i32, i32) {
    %c0_i32 = arith.constant 0 : i32
    %c0_i32_0 = arith.constant 0 : i32
    %c0_i32_1 = arith.constant 0 : i32
    return %c0_i32, %c0_i32_0 : i32, i32
  }
  func.func @transform_9(%arg0: i32) -> (i32, i32, i32) {
    %c0_i32 = arith.constant 0 : i32
    %c0_i32_0 = arith.constant 0 : i32
    %c0_i32_1 = arith.constant 0 : i32
    return %arg0, %c0_i32, %c0_i32_0 : i32, i32, i32
  }
}

</mosaic_0001>

<bundles_post_ra>
// kernel: tpu_custom_call.1
= control target key start
LH: loop header
LB: loop body
LE: loop exit
PB: predicated region body
PF: predicated region fallthrough
CT: control target
= control target key end

     0   :  { %14 = vsyncpa [#allocation3], 0  ;;  %s1421_s0 = inlined_call_operand.hbm [shape: f32[16,40], index: 0, kind: input, shape index: {}]   ;;  %s1422_s1 = inlined_call_operand.hbm [shape: f32[16,32], index: 1, kind: input, shape index: {}]   ;;  %s1423_s2 = inlined_call_operand.hbm [shape: f32[2,8,8], index: 2, kind: input, shape index: {}]   ;;  %s1424_s3 = inlined_call_operand.vmem [shape: f32[1,8], index: 3, kind: input, shape index: {}]   ;;  %s1425_s4 = inlined_call_operand.hbm [shape: f32[40,96], index: 4, kind: input, shape index: {}]   ;;  %s1426_s5 = inlined_call_operand.vmem [shape: f32[1,96], index: 5, kind: input, shape index: {}]   ;;  %s1427_s6 = inlined_call_operand.hbm [shape: f32[32,32], index: 6, kind: input, shape index: {}]   ;;  %s1428_s7 = inlined_call_operand.vmem [shape: f32[1,32], index: 7, kind: input, shape index: {}]   ;;  %s1429_s8 = inlined_call_operand.hbm [shape: f32[32,32], index: 8, kind: input, shape index: {}]   ;;  %s1430_s9 = inlined_call_operand.hbm [shape: s32[1,2,8], index: 9, kind: output, shape index: {}]  }
   0x1   :  { %15 = vsyncpa [#allocation6], 0 }
   0x2   :  { %16 = vsyncpa [#allocation9], 0 }
   0x3   :  { %17 = vsyncpa [#allocation12], 0 }
   0x4   :  { %18 = vsyncpa [#allocation4], 0  ;;  %s36_s11 = sshll.u32 %s1422_s1, 4  ;;  %s1205_s12 = smov [#allocation5]   ;;  %s37_s11 = int_to_ptr.hbm [resolvable:$true] %s36_s11 }
   0x5   :  { %s38_s13 = sshll.u32 %s1205_s12, 4  ;;  %s64_s16 = sshll.u32 %s1425_s4, 4  ;;  %s39_s13 = int_to_ptr.vmem [resolvable:$true] %s38_s13  ;;  %s65_s16 = int_to_ptr.hbm [resolvable:$true] %s64_s16 }
   0x6   :  { %s1206_s17 = smov 128   ;;  %s1207_s18 = smov 8  }
   0x7   :  { %44 = dma.hbm_to_vmem [thread:$0]  %s37_s11, 256, %s39_s13, [#allocation6], %s1206_s17, %s1206_s17, %s1207_s18  }
   0x8   :  { %s1208_s19 = smov [#allocation8]   ;;  %s23_s1 = sshll.u32 %s1421_s0, 4  ;;  %s24_s1 = int_to_ptr.hbm [resolvable:$true] %s23_s1 }
   0x9   :  { %s66_s20 = sshll.u32 %s1208_s19, 4  ;;  %s49_s24 = sshll.u32 %s1423_s2, 4  ;;  %s67_s20 = int_to_ptr.vmem [resolvable:$true] %s66_s20  ;;  %s50_s24 = int_to_ptr.hbm [resolvable:$true] %s49_s24 }
   0xa   :  { %72 = dma.hbm_to_vmem [thread:$0]  %s65_s16, 640, %s67_s20, [#allocation9], %s1206_s17, %s1206_s17, %s1207_s18  }
   0xb   :  { %s1209_s25 = smov [#allocation2]   ;;  %s1210_s27 = smov [#allocation7]  }
   0xc   :  { %s25_s26 = sshll.u32 %s1209_s25, 4  ;;  %s51_s0 = sshll.u32 %s1210_s27, 4  ;;  %s26_s26 = int_to_ptr.vmem [resolvable:$true] %s25_s26  ;;  %s52_s0 = int_to_ptr.vmem [resolvable:$true] %s51_s0 }
   0xd   :  { %31 = dma.hbm_to_vmem [thread:$0]  %s24_s1, 256, %s26_s26, [#allocation3], %s1206_s17, %s1206_s17, %s1207_s18  }
   0xe   :  { %s79_s30 = sshll.u32 %s1427_s6, 4  ;;  %s94_s11 = sshll.u32 %s1429_s8, 4  ;;  %s80_s30 = int_to_ptr.hbm [resolvable:$true] %s79_s30  ;;  %s95_s11 = int_to_ptr.hbm [resolvable:$true] %s94_s11 }
   0xf   :  { %57 = dma.hbm_to_vmem [thread:$0]  %s50_s24, 256, %s52_s0, [#allocation6], %s1206_s17, %s1206_s17, %s1207_s18  }
  0x10   :  { %s1211_s12 = smov [#allocation10]   ;;  %s1212_s14 = smov [#allocation11]  }
  0x11   :  { %s81_s13 = sshll.u32 %s1211_s12, 4  ;;  %s96_s6 = sshll.u32 %s1212_s14, 4  ;;  %s82_s13 = int_to_ptr.vmem [resolvable:$true] %s81_s13  ;;  %s97_s6 = int_to_ptr.vmem [resolvable:$true] %s96_s6 }
  0x12   :  { %87 = dma.hbm_to_vmem [thread:$0]  %s80_s30, 512, %s82_s13, [#allocation9], %s1206_s17, %s1206_s17, %s1207_s18  }
  0x13   :  { %102 = dma.hbm_to_vmem [thread:$0]  %s95_s11, 512, %s97_s6, [#allocation12], %s1206_s17, %s1206_s17, %s1207_s18  }
  0x14   :  { %1195 = dma.done.wait [#allocation3], 256  }
  0x15   :  { %1196 = vsyncadd [#allocation3], 4294967040 }
  0x16   :  { %1197 = dma.done.wait [#allocation6], 512  }
  0x17   :  { %1198 = vsyncadd [#allocation6], 4294966784 }
  0x18   :  { %1199 = dma.done.wait [#allocation9], 1152  }
  0x19   :  { %1200 = vsyncadd [#allocation9], 4294966144 }
  0x1a   :  { %1201 = dma.done.wait [#allocation12], 512  }
  0x1b   :  { %1202 = vsyncadd [#allocation12], 4294966784  ;;  %v135_v0 = vld [vmem:[#allocation8 + $0x20] sm:$0xff]  ;;  %v134_v1 = vld [vmem:[#allocation8 + $0x18] sm:$0xff]  ;;  %vm140_vm0 = vcmask 326656   ;;  %s1213_s16 = smov 88  }
  0x1c   :  { %158 = vmatpush.msra.mxu0 %v135_v0  ;;  %v133_v2 = vld [vmem:[#allocation8 + $0x10] sm:$0xff]  ;;  %v132_v3 = vld [vmem:[#allocation8 + $0x8] sm:$0xff]  ;;  %v131_v4 = vld [vmem:[#allocation8] sm:$0xff]  ;;  %s1214_s17 = smov 96   ;;  %s1215_s19 = smov 80   ;;  %vm177_vm1 = vcmask 64512  }
  0x1d   :  { %v127_v5 = vld [vmem:[#allocation2] sm:$0xff]  ;;  %v128_v6 = vld [vmem:[#allocation2 + $0x8] sm:$0xff]  ;;  %s1217_s20 = smov 72   ;;  %s1218_s21 = smov 112   ;;  %vm733_vm2 = vcmask 261120   ;;  %vm719_vm3 = vcmask 130048  }
  0x1e   :  { %159 = vmatpush.msra.mxu0 %v134_v1  ;;  %v988_v7 = vld [vmem:[%s1426_s5] ss:$0 sm:$0xff]  ;;  %s1216_s5 = smov 120   ;;  %s1219_s22 = smov 104   ;;  %vm722_vm4 = vcmask 195584   ;;  %vm898_vm9 = vcmask 1041409  }
  0x1f   :  { %s1220_s1 = smov 56   ;;  %s1221_s4 = smov 64   ;;  %v989_v32 = vld [vmem:[%s1424_s3] ss:$0 sm:$0xff]  ;;  %vm900_vm10 = vcmask 58368  }
  0x20   :  { %160 = vmatpush.msra.mxu0 %v133_v2  ;;  %s1222_s25 = smov 40   ;;  %s1223_s3 = smov 48  }
  0x21   :  { %s1224_s26 = smov 16   ;;  %s1225_s27 = smov 24  }
  0x22   :  { %161 = vmatpush.msra.mxu0 %v132_v3  ;;  %s909_s2 = sshll.u32 %s1430_s9, 4  ;;  %s910_s2 = int_to_ptr.hbm [resolvable:$true] %s909_s2 }
  0x24   :  { %162 = vmatpush.msra.mxu0 %v131_v4 }
  0x25   :  { %922 = vmatmul.msk.f32.vlgmr.msra.gmra.mxu0 %vm140_vm0, %v127_v5 }
  0x2d   :  { %923 = vmatmul.msk.f32.gmra.mxu0 %vm140_vm0, %v128_v6 }
  0xa2   :  { %v164_v8 = vpop.f32.mrf.mxu0 }
  0xa3   :  { %v1316_v9 = vadd.f32 %v988_v7, %v164_v8 }
  0xa5   :  { %305 = vrot.lane.b32.xlu2 %v1316_v9, %s1213_s16  ;;  %175 = vrot.lane.b32.xlu0 %v1316_v9, %s1214_s17 }
  0xaa   :  { %v167_v10 = vpop.f32.mrf.mxu0 }
  0xab   :  { %v1320_v11 = vadd.f32 %v988_v7, %v167_v10 }
  0xad   :  { %333 = vrot.lane.b32.xlu1 %v1320_v11, %s1213_s16  ;;  %435 = vrot.lane.b32.xlu2 %v1316_v9, %s1215_s19  ;;  %v983_v12 = vpack.i.bf16 %v1320_v11, %v1316_v9 }
  0xae   :  { %203 = vrot.lane.b32.xlu0 %v1320_v11, %s1214_s17 }
  0xb5   :  { %331 = vrot.lane.b32.xlu1 %v1320_v11, %s1216_s5  ;;  %565 = vrot.lane.b32.xlu2 %v1316_v9, %s1217_s20 }
  0xb6   :  { %303 = vrot.lane.b32.xlu0 %v1316_v9, %s1216_s5 }
  0xbd   :  { %433 = vrot.lane.b32.xlu1 %v1316_v9, %s1218_s21  ;;  %461 = vrot.lane.b32.xlu2 %v1320_v11, %s1218_s21 }
  0xbe   :  { %563 = vrot.lane.b32.xlu0 %v1316_v9, %s1219_s22 }
  0xc5   :  { %463 = vrot.lane.b32.xlu1 %v1320_v11, %s1215_s19  ;;  %984 = vrot.lane.b32.xlu2 %v983_v12, %s1220_s1 }
  0xc6   :  { %593 = vrot.lane.b32.xlu0 %v1320_v11, %s1217_s20 }
  0xcd   :  { %591 = vrot.lane.b32.xlu1 %v1320_v11, %s1219_s22 }
  0xd5   :  { %979 = vrot.lane.b32.xlu1 %v983_v12, %s1221_s4 }
  0xff   :  { %v306_v13 = vpop.permute.xlu2 %305 }
 0x107   :  { %v436_v14 = vpop.permute.xlu2 %435 }
 0x10f   :  { %v566_v15 = vpop.permute.xlu2 %565 }
 0x117   :  { %v462_v16 = vpop.permute.xlu2 %461  ;;  %v176_v17 = vpop.permute.xlu0 %175 }
 0x118   :  { %924 = vmatpush.xpose.msk.msra.mxu1 %vm177_vm1, %v176_v17 }
 0x11b   :  { %925 = vmatmul.msk.f32.vlgmr.msra.gmra.mxu1 %vm177_vm1, %v1316_v9 }
 0x11c   :  { %930 = vmatpush.xpose.msk.msrb.mxu1 %vm177_vm1, %v306_v13 }
 0x11f   :  { %v334_v18 = vpop.permute.xlu1 %333  ;;  %v1340_v19 = vpop.permute.xlu2 %984 }
 0x120   :  { %v987_v20 = vunpack.i.h.bf16 %v1340_v19  ;;  %v204_v21 = vpop.permute.xlu0 %203  ;;  %v986_v61 = vunpack.i.l.bf16 %v1340_v19 }
 0x121   :  { %926 = vmatpush.xpose.msk.msra.mxu2 %vm177_vm1, %v204_v21 }
 0x122   :  { %418 = vmatpush.msra.mxu1 %v987_v20 }
 0x124   :  { %927 = vmatmul.msk.f32.vlgmr.msra.gmra.mxu2 %vm177_vm1, %v1320_v11 }
 0x125   :  { %932 = vmatpush.xpose.msk.msrb.mxu2 %vm177_vm1, %v334_v18 }
 0x127   :  { %v332_v22 = vpop.permute.xlu1 %331 }
 0x128   :  { %v304_v23 = vpop.permute.xlu0 %303 }
 0x129   :  { %936 = vmatpush.xpose.msk.msra.mxu2 %vm177_vm1, %v436_v14  ;;  %931 = vmatmul.msk.f32.vlgmr.msrb.gmra.mxu1 %vm177_vm1, %v304_v23 }
 0x12c   :  { %933 = vmatmul.msk.f32.vlgmr.msrb.gmra.mxu2 %vm177_vm1, %v332_v22 }
 0x12d   :  { %942 = vmatpush.xpose.msk.msrb.mxu2 %vm177_vm1, %v566_v15 }
 0x12f   :  { %v434_v24 = vpop.permute.xlu1 %433 }
 0x130   :  { %v564_v25 = vpop.permute.xlu0 %563 }
 0x134   :  { %937 = vmatmul.msk.f32.vlgmr.msra.gmra.mxu2 %vm177_vm1, %v434_v24 }
 0x137   :  { %v464_v26 = vpop.permute.xlu1 %463 }
 0x138   :  { %v594_v27 = vpop.permute.xlu0 %593  ;;  %938 = vmatpush.xpose.msk.msrb.mxu0 %vm177_vm1, %v464_v26 }
 0x13b   :  { %939 = vmatmul.msk.f32.vlgmr.msrb.gmra.mxu0 %vm177_vm1, %v462_v16 }
 0x13c   :  { %944 = vmatpush.xpose.msk.msra.mxu0 %vm177_vm1, %v594_v27  ;;  %943 = vmatmul.msk.f32.vlgmr.msrb.gmra.mxu2 %vm177_vm1, %v564_v25 }
 0x13f   :  { %v592_v28 = vpop.permute.xlu1 %591 }
 0x143   :  { %945 = vmatmul.msk.f32.vlgmr.msra.gmra.mxu0 %vm177_vm1, %v592_v28 }
 0x147   :  { %v980_v29 = vpop.permute.xlu1 %979 }
 0x148   :  { %v981_v30 = vunpack.i.l.bf16 %v980_v29  ;;  %v982_v31 = vunpack.i.h.bf16 %v980_v29 }
 0x14a   :  { %262 = vmatpush.msra.mxu3 %v981_v30 }
 0x14c   :  { %288 = vmatpush.msrb.mxu3 %v982_v31 }
 0x198   :  { %v199_v33 = vpop.f32.mrf.mxu1 }
 0x199   :  { %v200_v34 = vadd.f32 %v989_v32, %v199_v33 }
 0x19b   :  { %v229_v35 = vsel %vm177_vm1, %v200_v34, -inf }
 0x19c   :  { %230 = vmax.xlane.f32.xlu2 %v229_v35 }
 0x1a6   :  { %v328_v36 = vpop.f32.mrf.mxu1 }
 0x1a7   :  { %v329_v37 = vadd.f32 %v989_v32, %v328_v36  ;;  %v226_v39 = vpop.f32.mrf.mxu2 }
 0x1a8   :  { %v227_v43 = vadd.f32 %v989_v32, %v226_v39 }
 0x1a9   :  { %v359_v38 = vsel %vm177_vm1, %v329_v37, -inf }
 0x1aa   :  { %360 = vmax.xlane.f32.xlu1 %v359_v38  ;;  %v232_v45 = vsel %vm177_vm1, %v227_v43, -inf }
 0x1af   :  { %v356_v44 = vpop.f32.mrf.mxu2 }
 0x1b0   :  { %v357_v50 = vadd.f32 %v989_v32, %v356_v44 }
 0x1b2   :  { %v362_v51 = vsel %vm177_vm1, %v357_v50, -inf }
 0x1b4   :  { %631 = vrot.lane.b32.xlu2 %v1316_v9, %s1222_s25 }
 0x1b7   :  { %v458_v48 = vpop.f32.mrf.mxu2 }
 0x1b8   :  { %v486_v40 = vpop.f32.mrf.mxu0  ;;  %v459_v54 = vadd.f32 %v989_v32, %v458_v48 }
 0x1b9   :  { %v487_v41 = vadd.f32 %v989_v32, %v486_v40 }
 0x1ba   :  { %v489_v56 = vsel %vm177_vm1, %v459_v54, -inf }
 0x1bb   :  { %v492_v42 = vsel %vm177_vm1, %v487_v41, -inf }
 0x1bc   :  { %493 = vmax.xlane.f32.xlu0 %v492_v42 }
 0x1bf   :  { %v588_v52 = vpop.f32.mrf.mxu2 }
 0x1c0   :  { %v616_v46 = vpop.f32.mrf.mxu0  ;;  %v589_v53 = vadd.f32 %v989_v32, %v588_v52 }
 0x1c1   :  { %v617_v47 = vadd.f32 %v989_v32, %v616_v46 }
 0x1c2   :  { %v619_v55 = vsel %vm177_vm1, %v589_v53, -inf }
 0x1c3   :  { %501 = vrot.lane.b32.xlu1 %v1316_v9, %s1223_s3  ;;  %v622_v49 = vsel %vm177_vm1, %v617_v47, -inf }
 0x1c4   :  { %233 = vmax.xlane.f32.xlu0 %v232_v45 }
 0x1cc   :  { %623 = vmax.xlane.f32.xlu0 %v622_v49 }
 0x1d4   :  { %363 = vmax.xlane.f32.xlu0 %v362_v51 }
 0x1dc   :  { %620 = vmax.xlane.f32.xlu0 %v619_v55 }
 0x1dd   :  { %490 = vmax.xlane.f32.xlu2 %v489_v56 }
 0x1f0   :  { %657 = vrot.lane.b32.xlu0 %v1320_v11, %s1222_s25 }
 0x1f5   :  { %527 = vrot.lane.b32.xlu2 %v1320_v11, %s1223_s3 }
 0x20f   :  { %v231_v57 = vpop.xlane.xlu2 %230 }
 0x210   :  { %v235_v58 = vsub.f32 %v200_v34, %v231_v57 }
 0x212   :  { %v237_v59 = vmul.f32 1.442695, %v235_v58 }
 0x214   :  { %991 = vpow2.f32 %v237_v59 }
 0x217   :  { %v632_v17 = vpop.permute.xlu2 %631 }
 0x21a   :  { %v1372_v60 = vpop.eup %991 }
 0x21b   :  { %928 = vmatmul.msk.f32.vlgmr.msra.gmra.mxu3 %vm177_vm1, %v1372_v60 }
 0x21c   :  { %392 = vmatpush.msra.mxu3 %v986_v61 }
 0x21d   :  { %v361_v62 = vpop.xlane.xlu1 %360 }
 0x21e   :  { %v365_v63 = vsub.f32 %v329_v37, %v361_v62  ;;  %v293_v37 = vsel %vm177_vm1, %v1372_v60, 0.0 }
 0x220   :  { %v367_v0 = vmul.f32 1.442695, %v365_v63 }
 0x222   :  { %993 = vpow2.f32 %v367_v0  ;;  %v728_v0 = vld [vmem:[#allocation10 + $0x18] sm:$0xff] }
 0x223   :  { %752 = vmatpush.msra.mxu2 %v728_v0 }
 0x228   :  { %v994_v1 = vpop.eup %993 }
 0x229   :  { %v423_v2 = vsel %vm177_vm1, %v994_v1, 0.0 }
 0x22a   :  { %424 = vadd.xlane.f32.xlu1 %v423_v2  ;;  %v766_v2 = vld [vmem:[#allocation11 + $0x18] sm:$0xff] }
 0x22b   :  { %785 = vmatpush.msrb.mxu0 %v766_v2 }
 0x22f   :  { %v494_v3 = vpop.xlane.xlu0 %493 }
 0x230   :  { %v496_v4 = vsub.f32 %v487_v41, %v494_v3  ;;  %v726_v3 = vld [vmem:[#allocation10 + $0x8] sm:$0xff] }
 0x232   :  { %v499_v5 = vmul.f32 1.442695, %v496_v4  ;;  %v725_v4 = vld [vmem:[#allocation10] sm:$0xff] }
 0x234   :  { %995 = vpow2.f32 %v499_v5  ;;  %v765_v5 = vld [vmem:[#allocation11 + $0x10] sm:$0xff] }
 0x235   :  { %v502_v15 = vpop.permute.xlu1 %501  ;;  %786 = vmatpush.msrb.mxu0 %v765_v5 }
 0x237   :  { %v234_v6 = vpop.xlane.xlu0 %233 }
 0x238   :  { %v236_v7 = vsub.f32 %v227_v43, %v234_v6  ;;  %v764_v6 = vld [vmem:[#allocation11 + $0x8] sm:$0xff] }
 0x239   :  { %787 = vmatpush.msrb.mxu0 %v764_v6 }
 0x23a   :  { %v996_v8 = vpop.eup %995  ;;  %v239_v9 = vmul.f32 1.442695, %v236_v7  ;;  %v763_v7 = vld [vmem:[#allocation11] sm:$0xff] }
 0x23b   :  { %v556_v10 = vsel %vm177_vm1, %v996_v8, 0.0  ;;  %788 = vmatpush.msrb.mxu0 %v763_v7 }
 0x23c   :  { %997 = vpow2.f32 %v239_v9  ;;  %557 = vadd.xlane.f32.xlu2 %v556_v10  ;;  %v130_v9 = vld [vmem:[#allocation5 + $0x8] sm:$0xff] }
 0x23f   :  { %v624_v11 = vpop.xlane.xlu0 %623 }
 0x240   :  { %v626_v12 = vsub.f32 %v617_v47, %v624_v11 }
 0x242   :  { %v998_v13 = vpop.eup %997  ;;  %v629_v14 = vmul.f32 1.442695, %v626_v12 }
 0x243   :  { %929 = vmatmul.msk.f32.vlgmr.msrb.gmra.mxu3 %vm177_vm1, %v998_v13  ;;  %v296_v33 = vsel %vm177_vm1, %v998_v13, 0.0 }
 0x244   :  { %999 = vpow2.f32 %v629_v14  ;;  %522 = vmatpush.msrb.mxu3 %v502_v15 }
 0x247   :  { %v364_v16 = vpop.xlane.xlu0 %363 }
 0x248   :  { %v366_v18 = vsub.f32 %v357_v50, %v364_v16 }
 0x24a   :  { %v1000_v19 = vpop.eup %999  ;;  %v369_v20 = vmul.f32 1.442695, %v366_v18 }
 0x24b   :  { %934 = vmatmul.msk.f32.vlgmr.msra.gmra.mxu3 %vm177_vm1, %v994_v1  ;;  %v686_v21 = vsel %vm177_vm1, %v1000_v19, 0.0  ;;  %v727_v1 = vld [vmem:[#allocation10 + $0x10] sm:$0xff] }
 0x24c   :  { %1001 = vpow2.f32 %v369_v20  ;;  %652 = vmatpush.msra.mxu3 %v632_v17  ;;  %687 = vadd.xlane.f32.xlu1 %v686_v21 }
 0x24d   :  { %753 = vmatpush.msra.mxu2 %v727_v1 }
 0x24f   :  { %v621_v22 = vpop.xlane.xlu0 %620  ;;  %754 = vmatpush.msra.mxu2 %v726_v3 }
 0x250   :  { %v625_v23 = vsub.f32 %v589_v53, %v621_v22  ;;  %v491_v24 = vpop.xlane.xlu2 %490 }
 0x251   :  { %v495_v25 = vsub.f32 %v459_v54, %v491_v24  ;;  %755 = vmatpush.msra.mxu2 %v725_v4 }
 0x252   :  { %v1002_v26 = vpop.eup %1001  ;;  %v627_v27 = vmul.f32 1.442695, %v625_v23 }
 0x253   :  { %v497_v28 = vmul.f32 1.442695, %v495_v25  ;;  %935 = vmatmul.msk.f32.vlgmr.msra.gmra.mxu1 %vm177_vm1, %v1002_v26  ;;  %v426_v29 = vsel %vm177_vm1, %v1002_v26, 0.0 }
 0x254   :  { %1003 = vpow2.f32 %v627_v27  ;;  %427 = vadd.xlane.f32.xlu1 %v426_v29 }
 0x255   :  { %1005 = vpow2.f32 %v497_v28 }
 0x258   :  { %v528_v30 = vpop.permute.xlu2 %527 }
 0x259   :  { %548 = vmatpush.msrb.mxu1 %v528_v30  ;;  %v990_v30 = vld [vmem:[%s1428_s7] ss:$0 sm:$0xff]  ;;  %s1226_s7 = smov [#allocation13]  }
 0x25a   :  { %v1004_v31 = vpop.eup %1003  ;;  %s907_s28 = sshll.u32 %s1226_s7, 4  ;;  %s908_s28 = int_to_ptr.vmem [resolvable:$true] %s907_s28 }
 0x25b   :  { %v1006_v32 = vpop.eup %1005  ;;  %941 = vmatmul.msk.f32.vlgmr.msrb.gmra.mxu1 %vm177_vm1, %v996_v8  ;;  %v683_v34 = vsel %vm177_vm1, %v1004_v31, 0.0  ;;  %v129_v8 = vld [vmem:[#allocation5] sm:$0xff] }
 0x25c   :  { %940 = vmatmul.msk.f32.vlgmr.msrb.gmra.mxu3 %vm177_vm1, %v1006_v32  ;;  %297 = vadd.xlane.f32.xlu1 %v296_v33  ;;  %v553_v35 = vsel %vm177_vm1, %v1006_v32, 0.0 }
 0x25d   :  { %684 = vadd.xlane.f32.xlu0 %v683_v34  ;;  %554 = vadd.xlane.f32.xlu2 %v553_v35 }
 0x25e   :  { %950 = vmatmul.msk.f32.vlgmr.msrb.gmra.mxu0 %vm733_vm2, %v129_v8 }
 0x262   :  { %v658_v36 = vpop.permute.xlu0 %657 }
 0x263   :  { %678 = vmatpush.msra.mxu1 %v658_v36 }
 0x264   :  { %946 = vmatmul.msk.f32.vlgmr.msra.gmra.mxu3 %vm177_vm1, %v1004_v31  ;;  %947 = vmatmul.msk.f32.vlgmr.msra.gmra.mxu1 %vm177_vm1, %v1000_v19 }
 0x265   :  { %294 = vadd.xlane.f32.xlu2 %v293_v37  ;;  %v850_v37 = vld [vmem:[#allocation7] sm:$0xff] }
 0x266   :  { %951 = vmatmul.msk.f32.gmra.mxu0 %vm733_vm2, %v130_v9 }
 0x29d   :  { %v425_v38 = vpop.xlane.xlu1 %424 }
 0x29e   :  { %v1393_v39 = vpop.f32.mrf.mxu3  ;;  %1007 = vrcp.f32 %v425_v38 }
 0x2a4   :  { %v1008_v43 = vpop.eup %1007 }
 0x2af   :  { %v558_v44 = vpop.xlane.xlu2 %557 }
 0x2bf   :  { %v688_v40 = vpop.xlane.xlu1 %687 }
 0x2c6   :  { %v1395_v41 = vpop.f32.mrf.mxu3 }
 0x2c7   :  { %v428_v42 = vpop.xlane.xlu1 %427 }
 0x2c8   :  { %1009 = vrcp.f32 %v428_v42 }
 0x2ce   :  { %v394_v45 = vpop.f32.mrf.mxu3  ;;  %v1010_v48 = vpop.eup %1009 }
 0x2cf   :  { %v431_v46 = vmul.f32 %v1008_v43, %v394_v45  ;;  %v298_v12 = vpop.xlane.xlu1 %297  ;;  %v860_v45 = vlaneseq }
 0x2d0   :  { %v420_v47 = vpop.f32.mrf.mxu1  ;;  %v555_v49 = vpop.xlane.xlu2 %554 }
 0x2d1   :  { %695 = vrot.lane.b32.xlu0 %v431_v46, %s1207_s18  ;;  %v432_v50 = vmul.f32 %v1010_v48, %v420_v47  ;;  %1011 = vrcp.f32 %v555_v49  ;;  %v685_v52 = vpop.xlane.xlu0 %684  ;;  %v861_v46 = vand.u32 127, %v860_v45 }
 0x2d2   :  { %1013 = vrcp.f32 %v688_v40 }
 0x2d3   :  { %1015 = vrcp.f32 %v558_v44 }
 0x2d4   :  { %1017 = vrcp.f32 %v685_v52 }
 0x2d7   :  { %v1012_v53 = vpop.eup %1011 }
 0x2d8   :  { %v550_v51 = vpop.f32.mrf.mxu1  ;;  %v1014_v56 = vpop.eup %1013 }
 0x2d9   :  { %697 = vrot.lane.b32.xlu0 %v432_v50, %s1207_s18  ;;  %v1016_v59 = vpop.eup %1015  ;;  %v295_v10 = vpop.xlane.xlu2 %294 }
 0x2da   :  { %v1018_v60 = vpop.eup %1017  ;;  %v562_v62 = vmul.f32 %v1016_v59, %v550_v51  ;;  %1019 = vrcp.f32 %v295_v10 }
 0x2db   :  { %1021 = vrcp.f32 %v298_v12  ;;  %v790_v28 = vpop.f32.mrf.mxu0 }
 0x2dc   :  { %952 = vmatpush.xpose.msk.msrb.mxu3 %vm733_vm2, %v790_v28 }
 0x2df   :  { %v524_v54 = vpop.f32.mrf.mxu3 }
 0x2e0   :  { %v561_v55 = vmul.f32 %v1012_v53, %v524_v54  ;;  %v1020_v13 = vpop.eup %1019 }
 0x2e1   :  { %v680_v57 = vpop.f32.mrf.mxu1  ;;  %v301_v14 = vmul.f32 %v1020_v13, %v1393_v39  ;;  %v1022_v18 = vpop.eup %1021  ;;  %v851_v39 = vld [vmem:[#allocation7 + $0x8] sm:$0xff] }
 0x2e2   :  { %v692_v58 = vmul.f32 %v1014_v56, %v680_v57  ;;  %703 = vrot.lane.b32.xlu2 %v561_v55, %s1224_s26  ;;  %v302_v22 = vmul.f32 %v1022_v18, %v1395_v41 }
 0x2e3   :  { %v793_v29 = vpop.f32.mrf.mxu0 }
 0x2e4   :  { %713 = vrot.lane.b32.xlu0 %v692_v58, %s1225_s27  ;;  %954 = vmatpush.xpose.msk.msrb.mxu1 %vm733_vm2, %v793_v29 }
 0x2e7   :  { %v654_v61 = vpop.f32.mrf.mxu3 }
 0x2e8   :  { %v691_v63 = vmul.f32 %v1018_v60, %v654_v61 }
 0x2ea   :  { %705 = vrot.lane.b32.xlu2 %v562_v62, %s1224_s26  ;;  %711 = vrot.lane.b32.xlu1 %v691_v63, %s1225_s27 }
 0x33c   :  { %v704_v15 = vpop.permute.xlu2 %703 }
 0x343   :  { %v696_v11 = vpop.permute.xlu0 %695 }
 0x344   :  { %v717_v16 = vsel %vm177_vm1, %v301_v14, %v696_v11  ;;  %v706_v25 = vpop.permute.xlu2 %705 }
 0x345   :  { %v720_v20 = vsel %vm719_vm3, %v717_v16, %v704_v15 }
 0x34b   :  { %v698_v17 = vpop.permute.xlu0 %697 }
 0x34c   :  { %v718_v23 = vsel %vm177_vm1, %v302_v22, %v698_v17 }
 0x34d   :  { %v721_v26 = vsel %vm719_vm3, %v718_v23, %v706_v25 }
 0x356   :  { %v714_v24 = vpop.permute.xlu0 %713 }
 0x357   :  { %v724_v27 = vsel %vm722_vm4, %v721_v26, %v714_v24 }
 0x35c   :  { %v712_v19 = vpop.permute.xlu1 %711 }
 0x35d   :  { %v723_v21 = vsel %vm722_vm4, %v720_v20, %v712_v19 }
 0x35e   :  { %948 = vmatmul.msk.f32.vlgmr.msra.gmra.mxu2 %vm733_vm2, %v723_v21 }
 0x366   :  { %949 = vmatmul.msk.f32.gmra.mxu2 %vm733_vm2, %v724_v27 }
 0x3e1   :  { %v757_v31 = vpop.f32.mrf.mxu2 }
 0x3e2   :  { %v758_v32 = vadd.f32 %v990_v30, %v757_v31 }
 0x3e4   :  { %953 = vmatmul.msk.f32.vlgmr.msrb.gmra.mxu3 %vm733_vm2, %v758_v32 }
 0x3e9   :  { %v760_v33 = vpop.f32.mrf.mxu2 }
 0x3ea   :  { %v761_v34 = vadd.f32 %v990_v30, %v760_v33 }
 0x3ec   :  { %955 = vmatmul.msk.f32.vlgmr.msrb.gmra.mxu1 %vm733_vm2, %v761_v34 }
 0x467   :  { %v819_v35 = vpop.f32.mrf.mxu3 }
 0x468   :  { %1023 = vtanh.f32 %v819_v35 }
 0x469   :  { %v845_v36 = vpop.f32.mrf.mxu1 }
 0x46a   :  { %1025 = vtanh.f32 %v845_v36 }
 0x46e   :  { %v1024_v38 = vpop.eup %1023 }
 0x46f   :  { %v852_v40 = vadd.f32 %v1024_v38, %v850_v37 }
 0x470   :  { %v1026_v41 = vpop.eup %1025 }
 0x471   :  { %v854_v42 = vsel %vm177_vm1, %v852_v40, -inf  ;;  %v853_v43 = vadd.f32 %v1026_v41, %v851_v39 }
 0x472   :  { %855 = vmax.xlane.f32.xlu1 %v854_v42 }
 0x473   :  { %v857_v44 = vsel %vm177_vm1, %v853_v43, -inf }
 0x474   :  { %858 = vmax.xlane.f32.xlu2 %v857_v44 }
 0x4e5   :  { %v856_v47 = vpop.xlane.xlu1 %855 }
 0x4e6   :  { %vm862_vm5 = vcmp.ge.f32.partialorder %v852_v40, %v856_v47 }
 0x4e7   :  { %v864_v48 = vsel %vm862_vm5, %v861_v46, 8  ;;  %v859_v49 = vpop.xlane.xlu2 %858 }
 0x4e8   :  { %v866_v50 = vsel %vm177_vm1, %v864_v48, 2147483647  ;;  %vm863_vm6 = vcmp.ge.f32.partialorder %v853_v43, %v859_v49 }
 0x4e9   :  { %v865_v51 = vsel %vm863_vm6, %v861_v46, 8  ;;  %v868_v52 = vshra.s32 %v866_v50, 16  ;;  %v867_v57 = vand.u32 65535, %v866_v50 }
 0x4ea   :  { %v881_v53 = vsel %vm177_vm1, %v865_v51, 2147483647 }
 0x4eb   :  { %v870_v54 = vcvt.s32.f32 %v868_v52  ;;  %v883_v55 = vshra.s32 %v881_v53, 16  ;;  %v882_v58 = vand.u32 65535, %v881_v53  ;;  %v869_v60 = vcvt.s32.f32 %v867_v57 }
 0x4ed   :  { %871 = vmin.xlane.f32.xlu0 %v870_v54  ;;  %v885_v56 = vcvt.s32.f32 %v883_v55  ;;  %v884_v63 = vcvt.s32.f32 %v882_v58 }
 0x4ef   :  { %886 = vmin.xlane.f32.xlu1 %v885_v56 }
 0x560   :  { %v872_v59 = vpop.xlane.xlu0 %871 }
 0x561   :  { %vm873_vm7 = vcmp.eq.f32.partialorder %v870_v54, %v872_v59  ;;  %v878_v1 = vcvt.f32.s32 %v872_v59 }
 0x562   :  { %v887_v61 = vpop.xlane.xlu1 %886  ;;  %v874_v62 = vsel %vm873_vm7, %v869_v60, inf }
 0x563   :  { %vm888_vm8 = vcmp.eq.f32.partialorder %v885_v56, %v887_v61  ;;  %875 = vmin.xlane.f32.xlu2 %v874_v62  ;;  %v893_v2 = vcvt.f32.s32 %v887_v61  ;;  %v879_v4 = vshll.u32 %v878_v1, 16 }
 0x564   :  { %v889_v0 = vsel %vm888_vm8, %v884_v63, inf }
 0x565   :  { %890 = vmin.xlane.f32.xlu0 %v889_v0  ;;  %v894_v7 = vshll.u32 %v893_v2, 16 }
 0x5d6   :  { %v876_v3 = vpop.xlane.xlu2 %875 }
 0x5d7   :  { %v877_v5 = vcvt.f32.s32 %v876_v3 }
 0x5d8   :  { %v891_v6 = vpop.xlane.xlu0 %890 }
 0x5d9   :  { %v880_v8 = vadd.s32 %v879_v4, %v877_v5  ;;  %v892_v9 = vcvt.f32.s32 %v891_v6 }
 0x5db   :  { %v895_v10 = vadd.s32 %v894_v7, %v892_v9  ;;  %v896_v11 = vperm.slane %v880_v8, %v861_v46 }
 0x5dd   :  { %v897_v12 = vperm.slane %v895_v10, %v861_v46 }
 0x5df   :  { %v899_v13 = vsel %vm898_vm9, %v897_v12, %v896_v11 }
 0x5e0   :  { %901 = vst.msk [vmem:[#allocation13] sm:$0x3] %vm900_vm10, %v899_v13 }
 0x5e1   :  { %912 = dma.vmem_to_hbm [thread:$0]  %s908_s28, 32, %s910_s2, [#allocation4]  }
 0x5e2   :  { %1203 = dma.done.wait [#allocation4], 32  }
 0x5e3   :  { %1204 = vsyncadd [#allocation4], 4294967264 }
 0x5e4   :  { %917 = vsyncpa [#allocation3], 1 }
 0x5e5   :  { %918 = vsyncpa [#allocation6], 1 }
 0x5e6   :  { %919 = vsyncpa [#allocation9], 1 }
 0x5e7   :  { %920 = vsyncpa [#allocation12], 1 }
 0x5e8   :  { %921 = vsyncpa [#allocation4], 1 }

</bundles_post_ra>
